<compile_context>
chip_gen: v7x
topology: tpu7x:2x2x1
jax: 0.10.0
libtpu: 0.0.40
codegen_flags: <defaults>
</compile_context>

<pallas_src>
import functools

import jax
import jax.numpy as jnp
from jax import lax
from jax.experimental import pallas as pl
from jax.experimental.pallas import tpu as pltpu


# ---------------------------------------------------------------------------
# Fused Pallas kernel: qkv -> per-head attention -> merge -> proj (+bias)
# ---------------------------------------------------------------------------
def _fused_global_attention_kernel(
    x_ref,        # (N, C)        one batch of tokens
    wqkv_ref,     # (C, 3C)       pre-transposed qkv weight
    wproj_ref,    # (C, C)        pre-transposed proj weight
    bproj_ref,    # (1, C)        proj bias
    o_ref,        # (N, C)        output block (lane-dense, heads merged)
    qkv_ref,      # (N, 3C) f32   VMEM scratch
    merged_ref,   # (N, C)  f32   VMEM scratch
    *,
    num_heads,
    scale,
):
    n, c = x_ref.shape
    hd = c // num_heads

    # 1) Fused QKV projection on the MXU, f32 accumulation, stays in VMEM.
    qkv_ref[...] = jnp.dot(
        x_ref[...], wqkv_ref[...], preferred_element_type=jnp.float32
    )

    # 2) Per-head attention. H is tiny and static, so a fully unrolled loop
    #    inside one kernel invocation (no per-head grid-step overhead).
    for h in range(num_heads):
        c0 = h * hd
        q = qkv_ref[:, c0:c0 + hd]                      # (N, hd)
        k = qkv_ref[:, c + c0:c + c0 + hd]              # (N, hd)
        v = qkv_ref[:, 2 * c + c0:2 * c + c0 + hd]      # (N, hd)

        # q @ k^T without materializing a transpose: contract last dims directly.
        s = lax.dot_general(
            q, k, (((1,), (1,)), ((), ())), preferred_element_type=jnp.float32
        ) * scale                                       # (N, N)

        m = jnp.max(s, axis=-1, keepdims=True)
        p = jnp.exp(s - m)
        denom = jnp.sum(p, axis=-1, keepdims=True)

        # PV matmul in native dtype (already f32), normalize AFTER the matmul so
        # only (N, hd) values are scaled; reciprocal goes to the (idle) EUP slot.
        o_un = jnp.dot(p, v, preferred_element_type=jnp.float32)      # (N, hd)
        merged_ref[:, c0:c0 + hd] = o_un * pl.reciprocal(denom, approx=True)

    # 3) Output projection + bias; single lane-dense (N, C) store.
    out = jnp.dot(
        merged_ref[...], wproj_ref[...], preferred_element_type=jnp.float32
    ) + bproj_ref[...]
    o_ref[...] = out.astype(o_ref.dtype)


# ---------------------------------------------------------------------------
# Wrapper
# ---------------------------------------------------------------------------
def global_attention_forward(cls, params, num_heads):
    """JAX/Pallas equivalent of GlobalAttention.forward (eval mode)."""
    B, N, C = cls.shape
    hd = C // num_heads
    scale = hd ** (-0.5)

    x2 = cls.reshape(B * N, C)          # contiguous: zero-copy bitcast
    w_qkv_t = params["w_qkv_t"]         # (C, 3C) pre-transposed at setup time
    w_proj_t = params["w_proj_t"]       # (C, C)  pre-transposed at setup time
    b_proj2 = params["b_proj_2d"]       # (1, C)

    kernel = functools.partial(
        _fused_global_attention_kernel, num_heads=num_heads, scale=scale
    )

    out = pl.pallas_call(
        kernel,
        grid=(B,),
        in_specs=[
            pl.BlockSpec((N, C), lambda b: (b, 0)),        # tokens of batch b
            pl.BlockSpec((C, 3 * C), lambda b: (0, 0)),    # qkv weight (resident)
            pl.BlockSpec((C, C), lambda b: (0, 0)),        # proj weight (resident)
            pl.BlockSpec((1, C), lambda b: (0, 0)),        # proj bias (resident)
        ],
        out_specs=pl.BlockSpec((N, C), lambda b: (b, 0)),
        out_shape=jax.ShapeDtypeStruct((B * N, C), cls.dtype),
        scratch_shapes=[
            pltpu.VMEM((N, 3 * C), jnp.float32),           # qkv scratch
            pltpu.VMEM((N, C), jnp.float32),               # merged-heads scratch
        ],
        compiler_params=pltpu.CompilerParams(
            dimension_semantics=("parallel",),             # shard batches on v7x
        ),
    )(x2, w_qkv_t, w_proj_t, b_proj2)
    return out.reshape(B, N, C)


def make_params(key, C):
    """PyTorch nn.Linear layout weights + pre-transposed copies for the kernel."""
    k_qkv, k_proj, k_bias = jax.random.split(key, 3)
    w_qkv = jax.random.normal(k_qkv, (3 * C, C), dtype=jnp.float32) * 0.05
    w_proj = jax.random.normal(k_proj, (C, C), dtype=jnp.float32) * 0.05
    b_proj = jax.random.normal(k_bias, (C,), dtype=jnp.float32) * 0.01
    return {
        "w_qkv": w_qkv,                      # (3C, C)  PyTorch layout (for ref)
        "w_proj": w_proj,                    # (C, C)   PyTorch layout (for ref)
        "b_proj": b_proj,                    # (C,)
        # pre-transposed once here so the traced forward has no per-call .T:
        "w_qkv_t": jnp.asarray(w_qkv.T),     # (C, 3C)
        "w_proj_t": jnp.asarray(w_proj.T),   # (C, C)
        "b_proj_2d": b_proj.reshape(1, C),   # (1, C)
    }


# ---------------------------------------------------------------------------
# Pure-JAX reference (for verification)
# ---------------------------------------------------------------------------
def global_attention_ref(cls, params, num_heads):
    B, N, C = cls.shape
    hd = C // num_heads
    scale = hd ** (-0.5)
    qkv = cls.reshape(B * N, C) @ params["w_qkv"].T
    qkv = qkv.reshape(B, N, 3, num_heads, hd).transpose(2, 0, 3, 1, 4)
    q, k, v = qkv[0], qkv[1], qkv[2]
    attn = jnp.einsum("bhnd,bhmd->bhnm", q, k) * scale
    attn = jax.nn.softmax(attn, axis=-1)
    out = jnp.einsum("bhnm,bhmd->bhnd", attn, v)
    out = out.transpose(0, 2, 1, 3).reshape(B * N, C)
    out = out @ params["w_proj"].T + params["b_proj"]
    return out.reshape(B, N, C)


# ---------------------------------------------------------------------------
# Main
# ---------------------------------------------------------------------------
if __name__ == "__main__":
    B, N, C = 2, 8, 32
    num_heads = 8

    key = jax.random.PRNGKey(0)
    k_x, k_params = jax.random.split(key, 2)

    x = jax.random.normal(k_x, (B, N, C), dtype=jnp.float32)
    params = make_params(k_params, C)

    out = global_attention_forward(x, params, num_heads)
    out = jax.block_until_ready(out)

    ref = global_attention_ref(x, params, num_heads)
    assert out.shape == (B, N, C)
    # Tolerance slightly relaxed vs 1e-5 because the softmax normalization uses
    # the hardware approximate reciprocal (pl.reciprocal(..., approx=True)).
    assert jnp.allclose(out, ref, atol=2e-3, rtol=2e-3), "mismatch vs reference"

    # TODO(synk): attn_drop / proj_drop are identity here (p=0.0 / eval mode);
    # training-mode dropout would need pltpu.prng_* inside the kernel.
    print("KERNEL_OK")
</pallas_src>

<mosaic_0001>
module attributes {stable_mosaic.version = 11 : i64} {
  func.func @_fused_global_attention_kernel(%arg0: i32, %arg1: memref<8x32xf32, #tpu.memory_space<vmem>>, %arg2: memref<32x96xf32, #tpu.memory_space<vmem>>, %arg3: memref<32x32xf32, #tpu.memory_space<vmem>>, %arg4: memref<1x32xf32, #tpu.memory_space<vmem>>, %arg5: memref<8x32xf32, #tpu.memory_space<vmem>>, %arg6: memref<8x96xf32, #tpu.memory_space<vmem>>, %arg7: memref<8x32xf32, #tpu.memory_space<vmem>>) attributes {dimension_semantics = [#tpu.dimension_semantics<parallel>], iteration_bounds = array<i64: 2>, scalar_prefetch = 0 : i64, scratch_operands = 2 : i64, tpu.core_type = #tpu.core_type<tc>, window_params = [{transform_indices = @transform_0, window_bounds = array<i64: 8, 32>}, {pipeline_mode = #tpu.pipeline_mode<synchronous>, transform_indices = @transform_1, window_bounds = array<i64: 32, 96>}, {pipeline_mode = #tpu.pipeline_mode<synchronous>, transform_indices = @transform_2, window_bounds = array<i64: 32, 32>}, {pipeline_mode = #tpu.pipeline_mode<synchronous>, transform_indices = @transform_3, window_bounds = array<i64: 1, 32>}, {transform_indices = @transform_4, window_bounds = array<i64: 8, 32>}]} {
    %c0 = arith.constant 0 : index
    %c0_0 = arith.constant 0 : index
    %0 = vector.load %arg1[%c0, %c0_0] : memref<8x32xf32, #tpu.memory_space<vmem>>, vector<8x32xf32>
    %c0_1 = arith.constant 0 : index
    %c0_2 = arith.constant 0 : index
    %1 = vector.load %arg2[%c0_1, %c0_2] : memref<32x96xf32, #tpu.memory_space<vmem>>, vector<32x96xf32>
    %cst = arith.constant dense<0.000000e+00> : vector<8x96xf32>
    %2 = tpu.matmul %0, %1, %cst {dimension_numbers = #tpu.dot_dimension_numbers<[1], [0], [0], [1], [0, 0, 1, 1], [], []>} : vector<8x32xf32>, vector<32x96xf32>, vector<8x96xf32> -> vector<8x96xf32>
    %c0_3 = arith.constant 0 : index
    %c0_4 = arith.constant 0 : index
    %3 = vector.load %arg6[%c0_3, %c0_4] : memref<8x96xf32, #tpu.memory_space<vmem>>, vector<8x96xf32>
    tpu.vector_store %arg6[%c0_3, %c0_4], %2 {strides = array<i32>} : memref<8x96xf32, #tpu.memory_space<vmem>>, vector<8x96xf32>,
    %c0_5 = arith.constant 0 : index
    %c0_6 = arith.constant 0 : index
    %4 = vector.load %arg6[%c0_5, %c0_6] : memref<8x96xf32, #tpu.memory_space<vmem>>, vector<8x4xf32>
    %c0_7 = arith.constant 0 : index
    %c32 = arith.constant 32 : index
    %5 = vector.load %arg6[%c0_7, %c32] : memref<8x96xf32, #tpu.memory_space<vmem>>, vector<8x4xf32>
    %c0_8 = arith.constant 0 : index
    %c64 = arith.constant 64 : index
    %6 = vector.load %arg6[%c0_8, %c64] : memref<8x96xf32, #tpu.memory_space<vmem>>, vector<8x4xf32>
    %cst_9 = arith.constant dense<0.000000e+00> : vector<8x8xf32>
    %7 = tpu.matmul %4, %5, %cst_9 {dimension_numbers = #tpu.dot_dimension_numbers<[1], [1], [0], [0], [0, 0, 1, 0], [], []>} : vector<8x4xf32>, vector<8x4xf32>, vector<8x8xf32> -> vector<8x8xf32>
    %cst_10 = arith.constant 5.000000e-01 : f32
    %8 = vector.broadcast %cst_10 : f32 to vector<8x8xf32>
    %9 = arith.mulf %7, %8 : vector<8x8xf32>
    %cst_11 = arith.constant dense<0xFF800000> : vector<8xf32>
    %10 = vector.multi_reduction <maximumf>, %9, %cst_11 [1] : vector<8x8xf32> to vector<8xf32>
    %11 = vector.shape_cast %10 : vector<8xf32> to vector<8x1xf32>
    %12 = vector.broadcast %11 : vector<8x1xf32> to vector<8x8xf32>
    %13 = arith.subf %9, %12 : vector<8x8xf32>
    %14 = math.exp %13 : vector<8x8xf32>
    %cst_12 = arith.constant dense<0.000000e+00> : vector<8xf32>
    %15 = vector.multi_reduction <add>, %14, %cst_12 [1] : vector<8x8xf32> to vector<8xf32>
    %16 = vector.shape_cast %15 : vector<8xf32> to vector<8x1xf32>
    %cst_13 = arith.constant dense<0.000000e+00> : vector<8x4xf32>
    %17 = tpu.matmul %14, %6, %cst_13 {dimension_numbers = #tpu.dot_dimension_numbers<[1], [0], [0], [1], [0, 0, 1, 1], [], []>} : vector<8x8xf32>, vector<8x4xf32>, vector<8x4xf32> -> vector<8x4xf32>
    %18 = tpu.reciprocal %16 {approx = true} : vector<8x1xf32> -> vector<8x1xf32>
    %19 = vector.broadcast %18 : vector<8x1xf32> to vector<8x4xf32>
    %20 = arith.mulf %17, %19 : vector<8x4xf32>
    %c0_14 = arith.constant 0 : index
    %c0_15 = arith.constant 0 : index
    %21 = vector.load %arg7[%c0_14, %c0_15] : memref<8x32xf32, #tpu.memory_space<vmem>>, vector<8x4xf32>
    tpu.vector_store %arg7[%c0_14, %c0_15], %20 {strides = array<i32>} : memref<8x32xf32, #tpu.memory_space<vmem>>, vector<8x4xf32>,
    %c0_16 = arith.constant 0 : index
    %c4 = arith.constant 4 : index
    %22 = vector.load %arg6[%c0_16, %c4] : memref<8x96xf32, #tpu.memory_space<vmem>>, vector<8x4xf32>
    %c0_17 = arith.constant 0 : index
    %c36 = arith.constant 36 : index
    %23 = vector.load %arg6[%c0_17, %c36] : memref<8x96xf32, #tpu.memory_space<vmem>>, vector<8x4xf32>
    %c0_18 = arith.constant 0 : index
    %c68 = arith.constant 68 : index
    %24 = vector.load %arg6[%c0_18, %c68] : memref<8x96xf32, #tpu.memory_space<vmem>>, vector<8x4xf32>
    %cst_19 = arith.constant dense<0.000000e+00> : vector<8x8xf32>
    %25 = tpu.matmul %22, %23, %cst_19 {dimension_numbers = #tpu.dot_dimension_numbers<[1], [1], [0], [0], [0, 0, 1, 0], [], []>} : vector<8x4xf32>, vector<8x4xf32>, vector<8x8xf32> -> vector<8x8xf32>
    %cst_20 = arith.constant 5.000000e-01 : f32
    %26 = vector.broadcast %cst_20 : f32 to vector<8x8xf32>
    %27 = arith.mulf %25, %26 : vector<8x8xf32>
    %cst_21 = arith.constant dense<0xFF800000> : vector<8xf32>
    %28 = vector.multi_reduction <maximumf>, %27, %cst_21 [1] : vector<8x8xf32> to vector<8xf32>
    %29 = vector.shape_cast %28 : vector<8xf32> to vector<8x1xf32>
    %30 = vector.broadcast %29 : vector<8x1xf32> to vector<8x8xf32>
    %31 = arith.subf %27, %30 : vector<8x8xf32>
    %32 = math.exp %31 : vector<8x8xf32>
    %cst_22 = arith.constant dense<0.000000e+00> : vector<8xf32>
    %33 = vector.multi_reduction <add>, %32, %cst_22 [1] : vector<8x8xf32> to vector<8xf32>
    %34 = vector.shape_cast %33 : vector<8xf32> to vector<8x1xf32>
    %cst_23 = arith.constant dense<0.000000e+00> : vector<8x4xf32>
    %35 = tpu.matmul %32, %24, %cst_23 {dimension_numbers = #tpu.dot_dimension_numbers<[1], [0], [0], [1], [0, 0, 1, 1], [], []>} : vector<8x8xf32>, vector<8x4xf32>, vector<8x4xf32> -> vector<8x4xf32>
    %36 = tpu.reciprocal %34 {approx = true} : vector<8x1xf32> -> vector<8x1xf32>
    %37 = vector.broadcast %36 : vector<8x1xf32> to vector<8x4xf32>
    %38 = arith.mulf %35, %37 : vector<8x4xf32>
    %c0_24 = arith.constant 0 : index
    %c4_25 = arith.constant 4 : index
    %39 = vector.load %arg7[%c0_24, %c4_25] : memref<8x32xf32, #tpu.memory_space<vmem>>, vector<8x4xf32>
    tpu.vector_store %arg7[%c0_24, %c4_25], %38 {strides = array<i32>} : memref<8x32xf32, #tpu.memory_space<vmem>>, vector<8x4xf32>,
    %c0_26 = arith.constant 0 : index
    %c8 = arith.constant 8 : index
    %40 = vector.load %arg6[%c0_26, %c8] : memref<8x96xf32, #tpu.memory_space<vmem>>, vector<8x4xf32>
    %c0_27 = arith.constant 0 : index
    %c40 = arith.constant 40 : index
    %41 = vector.load %arg6[%c0_27, %c40] : memref<8x96xf32, #tpu.memory_space<vmem>>, vector<8x4xf32>
    %c0_28 = arith.constant 0 : index
    %c72 = arith.constant 72 : index
    %42 = vector.load %arg6[%c0_28, %c72] : memref<8x96xf32, #tpu.memory_space<vmem>>, vector<8x4xf32>
    %cst_29 = arith.constant dense<0.000000e+00> : vector<8x8xf32>
    %43 = tpu.matmul %40, %41, %cst_29 {dimension_numbers = #tpu.dot_dimension_numbers<[1], [1], [0], [0], [0, 0, 1, 0], [], []>} : vector<8x4xf32>, vector<8x4xf32>, vector<8x8xf32> -> vector<8x8xf32>
    %cst_30 = arith.constant 5.000000e-01 : f32
    %44 = vector.broadcast %cst_30 : f32 to vector<8x8xf32>
    %45 = arith.mulf %43, %44 : vector<8x8xf32>
    %cst_31 = arith.constant dense<0xFF800000> : vector<8xf32>
    %46 = vector.multi_reduction <maximumf>, %45, %cst_31 [1] : vector<8x8xf32> to vector<8xf32>
    %47 = vector.shape_cast %46 : vector<8xf32> to vector<8x1xf32>
    %48 = vector.broadcast %47 : vector<8x1xf32> to vector<8x8xf32>
    %49 = arith.subf %45, %48 : vector<8x8xf32>
    %50 = math.exp %49 : vector<8x8xf32>
    %cst_32 = arith.constant dense<0.000000e+00> : vector<8xf32>
    %51 = vector.multi_reduction <add>, %50, %cst_32 [1] : vector<8x8xf32> to vector<8xf32>
    %52 = vector.shape_cast %51 : vector<8xf32> to vector<8x1xf32>
    %cst_33 = arith.constant dense<0.000000e+00> : vector<8x4xf32>
    %53 = tpu.matmul %50, %42, %cst_33 {dimension_numbers = #tpu.dot_dimension_numbers<[1], [0], [0], [1], [0, 0, 1, 1], [], []>} : vector<8x8xf32>, vector<8x4xf32>, vector<8x4xf32> -> vector<8x4xf32>
    %54 = tpu.reciprocal %52 {approx = true} : vector<8x1xf32> -> vector<8x1xf32>
    %55 = vector.broadcast %54 : vector<8x1xf32> to vector<8x4xf32>
    %56 = arith.mulf %53, %55 : vector<8x4xf32>
    %c0_34 = arith.constant 0 : index
    %c8_35 = arith.constant 8 : index
    %57 = vector.load %arg7[%c0_34, %c8_35] : memref<8x32xf32, #tpu.memory_space<vmem>>, vector<8x4xf32>
    tpu.vector_store %arg7[%c0_34, %c8_35], %56 {strides = array<i32>} : memref<8x32xf32, #tpu.memory_space<vmem>>, vector<8x4xf32>,
    %c0_36 = arith.constant 0 : index
    %c12 = arith.constant 12 : index
    %58 = vector.load %arg6[%c0_36, %c12] : memref<8x96xf32, #tpu.memory_space<vmem>>, vector<8x4xf32>
    %c0_37 = arith.constant 0 : index
    %c44 = arith.constant 44 : index
    %59 = vector.load %arg6[%c0_37, %c44] : memref<8x96xf32, #tpu.memory_space<vmem>>, vector<8x4xf32>
    %c0_38 = arith.constant 0 : index
    %c76 = arith.constant 76 : index
    %60 = vector.load %arg6[%c0_38, %c76] : memref<8x96xf32, #tpu.memory_space<vmem>>, vector<8x4xf32>
    %cst_39 = arith.constant dense<0.000000e+00> : vector<8x8xf32>
    %61 = tpu.matmul %58, %59, %cst_39 {dimension_numbers = #tpu.dot_dimension_numbers<[1], [1], [0], [0], [0, 0, 1, 0], [], []>} : vector<8x4xf32>, vector<8x4xf32>, vector<8x8xf32> -> vector<8x8xf32>
    %cst_40 = arith.constant 5.000000e-01 : f32
    %62 = vector.broadcast %cst_40 : f32 to vector<8x8xf32>
    %63 = arith.mulf %61, %62 : vector<8x8xf32>
    %cst_41 = arith.constant dense<0xFF800000> : vector<8xf32>
    %64 = vector.multi_reduction <maximumf>, %63, %cst_41 [1] : vector<8x8xf32> to vector<8xf32>
    %65 = vector.shape_cast %64 : vector<8xf32> to vector<8x1xf32>
    %66 = vector.broadcast %65 : vector<8x1xf32> to vector<8x8xf32>
    %67 = arith.subf %63, %66 : vector<8x8xf32>
    %68 = math.exp %67 : vector<8x8xf32>
    %cst_42 = arith.constant dense<0.000000e+00> : vector<8xf32>
    %69 = vector.multi_reduction <add>, %68, %cst_42 [1] : vector<8x8xf32> to vector<8xf32>
    %70 = vector.shape_cast %69 : vector<8xf32> to vector<8x1xf32>
    %cst_43 = arith.constant dense<0.000000e+00> : vector<8x4xf32>
    %71 = tpu.matmul %68, %60, %cst_43 {dimension_numbers = #tpu.dot_dimension_numbers<[1], [0], [0], [1], [0, 0, 1, 1], [], []>} : vector<8x8xf32>, vector<8x4xf32>, vector<8x4xf32> -> vector<8x4xf32>
    %72 = tpu.reciprocal %70 {approx = true} : vector<8x1xf32> -> vector<8x1xf32>
    %73 = vector.broadcast %72 : vector<8x1xf32> to vector<8x4xf32>
    %74 = arith.mulf %71, %73 : vector<8x4xf32>
    %c0_44 = arith.constant 0 : index
    %c12_45 = arith.constant 12 : index
    %75 = vector.load %arg7[%c0_44, %c12_45] : memref<8x32xf32, #tpu.memory_space<vmem>>, vector<8x4xf32>
    tpu.vector_store %arg7[%c0_44, %c12_45], %74 {strides = array<i32>} : memref<8x32xf32, #tpu.memory_space<vmem>>, vector<8x4xf32>,
    %c0_46 = arith.constant 0 : index
    %c16 = arith.constant 16 : index
    %76 = vector.load %arg6[%c0_46, %c16] : memref<8x96xf32, #tpu.memory_space<vmem>>, vector<8x4xf32>
    %c0_47 = arith.constant 0 : index
    %c48 = arith.constant 48 : index
    %77 = vector.load %arg6[%c0_47, %c48] : memref<8x96xf32, #tpu.memory_space<vmem>>, vector<8x4xf32>
    %c0_48 = arith.constant 0 : index
    %c80 = arith.constant 80 : index
    %78 = vector.load %arg6[%c0_48, %c80] : memref<8x96xf32, #tpu.memory_space<vmem>>, vector<8x4xf32>
    %cst_49 = arith.constant dense<0.000000e+00> : vector<8x8xf32>
    %79 = tpu.matmul %76, %77, %cst_49 {dimension_numbers = #tpu.dot_dimension_numbers<[1], [1], [0], [0], [0, 0, 1, 0], [], []>} : vector<8x4xf32>, vector<8x4xf32>, vector<8x8xf32> -> vector<8x8xf32>
    %cst_50 = arith.constant 5.000000e-01 : f32
    %80 = vector.broadcast %cst_50 : f32 to vector<8x8xf32>
    %81 = arith.mulf %79, %80 : vector<8x8xf32>
    %cst_51 = arith.constant dense<0xFF800000> : vector<8xf32>
    %82 = vector.multi_reduction <maximumf>, %81, %cst_51 [1] : vector<8x8xf32> to vector<8xf32>
    %83 = vector.shape_cast %82 : vector<8xf32> to vector<8x1xf32>
    %84 = vector.broadcast %83 : vector<8x1xf32> to vector<8x8xf32>
    %85 = arith.subf %81, %84 : vector<8x8xf32>
    %86 = math.exp %85 : vector<8x8xf32>
    %cst_52 = arith.constant dense<0.000000e+00> : vector<8xf32>
    %87 = vector.multi_reduction <add>, %86, %cst_52 [1] : vector<8x8xf32> to vector<8xf32>
    %88 = vector.shape_cast %87 : vector<8xf32> to vector<8x1xf32>
    %cst_53 = arith.constant dense<0.000000e+00> : vector<8x4xf32>
    %89 = tpu.matmul %86, %78, %cst_53 {dimension_numbers = #tpu.dot_dimension_numbers<[1], [0], [0], [1], [0, 0, 1, 1], [], []>} : vector<8x8xf32>, vector<8x4xf32>, vector<8x4xf32> -> vector<8x4xf32>
    %90 = tpu.reciprocal %88 {approx = true} : vector<8x1xf32> -> vector<8x1xf32>
    %91 = vector.broadcast %90 : vector<8x1xf32> to vector<8x4xf32>
    %92 = arith.mulf %89, %91 : vector<8x4xf32>
    %c0_54 = arith.constant 0 : index
    %c16_55 = arith.constant 16 : index
    %93 = vector.load %arg7[%c0_54, %c16_55] : memref<8x32xf32, #tpu.memory_space<vmem>>, vector<8x4xf32>
    tpu.vector_store %arg7[%c0_54, %c16_55], %92 {strides = array<i32>} : memref<8x32xf32, #tpu.memory_space<vmem>>, vector<8x4xf32>,
    %c0_56 = arith.constant 0 : index
    %c20 = arith.constant 20 : index
    %94 = vector.load %arg6[%c0_56, %c20] : memref<8x96xf32, #tpu.memory_space<vmem>>, vector<8x4xf32>
    %c0_57 = arith.constant 0 : index
    %c52 = arith.constant 52 : index
    %95 = vector.load %arg6[%c0_57, %c52] : memref<8x96xf32, #tpu.memory_space<vmem>>, vector<8x4xf32>
    %c0_58 = arith.constant 0 : index
    %c84 = arith.constant 84 : index
    %96 = vector.load %arg6[%c0_58, %c84] : memref<8x96xf32, #tpu.memory_space<vmem>>, vector<8x4xf32>
    %cst_59 = arith.constant dense<0.000000e+00> : vector<8x8xf32>
    %97 = tpu.matmul %94, %95, %cst_59 {dimension_numbers = #tpu.dot_dimension_numbers<[1], [1], [0], [0], [0, 0, 1, 0], [], []>} : vector<8x4xf32>, vector<8x4xf32>, vector<8x8xf32> -> vector<8x8xf32>
    %cst_60 = arith.constant 5.000000e-01 : f32
    %98 = vector.broadcast %cst_60 : f32 to vector<8x8xf32>
    %99 = arith.mulf %97, %98 : vector<8x8xf32>
    %cst_61 = arith.constant dense<0xFF800000> : vector<8xf32>
    %100 = vector.multi_reduction <maximumf>, %99, %cst_61 [1] : vector<8x8xf32> to vector<8xf32>
    %101 = vector.shape_cast %100 : vector<8xf32> to vector<8x1xf32>
    %102 = vector.broadcast %101 : vector<8x1xf32> to vector<8x8xf32>
    %103 = arith.subf %99, %102 : vector<8x8xf32>
    %104 = math.exp %103 : vector<8x8xf32>
    %cst_62 = arith.constant dense<0.000000e+00> : vector<8xf32>
    %105 = vector.multi_reduction <add>, %104, %cst_62 [1] : vector<8x8xf32> to vector<8xf32>
    %106 = vector.shape_cast %105 : vector<8xf32> to vector<8x1xf32>
    %cst_63 = arith.constant dense<0.000000e+00> : vector<8x4xf32>
    %107 = tpu.matmul %104, %96, %cst_63 {dimension_numbers = #tpu.dot_dimension_numbers<[1], [0], [0], [1], [0, 0, 1, 1], [], []>} : vector<8x8xf32>, vector<8x4xf32>, vector<8x4xf32> -> vector<8x4xf32>
    %108 = tpu.reciprocal %106 {approx = true} : vector<8x1xf32> -> vector<8x1xf32>
    %109 = vector.broadcast %108 : vector<8x1xf32> to vector<8x4xf32>
    %110 = arith.mulf %107, %109 : vector<8x4xf32>
    %c0_64 = arith.constant 0 : index
    %c20_65 = arith.constant 20 : index
    %111 = vector.load %arg7[%c0_64, %c20_65] : memref<8x32xf32, #tpu.memory_space<vmem>>, vector<8x4xf32>
    tpu.vector_store %arg7[%c0_64, %c20_65], %110 {strides = array<i32>} : memref<8x32xf32, #tpu.memory_space<vmem>>, vector<8x4xf32>,
    %c0_66 = arith.constant 0 : index
    %c24 = arith.constant 24 : index
    %112 = vector.load %arg6[%c0_66, %c24] : memref<8x96xf32, #tpu.memory_space<vmem>>, vector<8x4xf32>
    %c0_67 = arith.constant 0 : index
    %c56 = arith.constant 56 : index
    %113 = vector.load %arg6[%c0_67, %c56] : memref<8x96xf32, #tpu.memory_space<vmem>>, vector<8x4xf32>
    %c0_68 = arith.constant 0 : index
    %c88 = arith.constant 88 : index
    %114 = vector.load %arg6[%c0_68, %c88] : memref<8x96xf32, #tpu.memory_space<vmem>>, vector<8x4xf32>
    %cst_69 = arith.constant dense<0.000000e+00> : vector<8x8xf32>
    %115 = tpu.matmul %112, %113, %cst_69 {dimension_numbers = #tpu.dot_dimension_numbers<[1], [1], [0], [0], [0, 0, 1, 0], [], []>} : vector<8x4xf32>, vector<8x4xf32>, vector<8x8xf32> -> vector<8x8xf32>
    %cst_70 = arith.constant 5.000000e-01 : f32
    %116 = vector.broadcast %cst_70 : f32 to vector<8x8xf32>
    %117 = arith.mulf %115, %116 : vector<8x8xf32>
    %cst_71 = arith.constant dense<0xFF800000> : vector<8xf32>
    %118 = vector.multi_reduction <maximumf>, %117, %cst_71 [1] : vector<8x8xf32> to vector<8xf32>
    %119 = vector.shape_cast %118 : vector<8xf32> to vector<8x1xf32>
    %120 = vector.broadcast %119 : vector<8x1xf32> to vector<8x8xf32>
    %121 = arith.subf %117, %120 : vector<8x8xf32>
    %122 = math.exp %121 : vector<8x8xf32>
    %cst_72 = arith.constant dense<0.000000e+00> : vector<8xf32>
    %123 = vector.multi_reduction <add>, %122, %cst_72 [1] : vector<8x8xf32> to vector<8xf32>
    %124 = vector.shape_cast %123 : vector<8xf32> to vector<8x1xf32>
    %cst_73 = arith.constant dense<0.000000e+00> : vector<8x4xf32>
    %125 = tpu.matmul %122, %114, %cst_73 {dimension_numbers = #tpu.dot_dimension_numbers<[1], [0], [0], [1], [0, 0, 1, 1], [], []>} : vector<8x8xf32>, vector<8x4xf32>, vector<8x4xf32> -> vector<8x4xf32>
    %126 = tpu.reciprocal %124 {approx = true} : vector<8x1xf32> -> vector<8x1xf32>
    %127 = vector.broadcast %126 : vector<8x1xf32> to vector<8x4xf32>
    %128 = arith.mulf %125, %127 : vector<8x4xf32>
    %c0_74 = arith.constant 0 : index
    %c24_75 = arith.constant 24 : index
    %129 = vector.load %arg7[%c0_74, %c24_75] : memref<8x32xf32, #tpu.memory_space<vmem>>, vector<8x4xf32>
    tpu.vector_store %arg7[%c0_74, %c24_75], %128 {strides = array<i32>} : memref<8x32xf32, #tpu.memory_space<vmem>>, vector<8x4xf32>,
    %c0_76 = arith.constant 0 : index
    %c28 = arith.constant 28 : index
    %130 = vector.load %arg6[%c0_76, %c28] : memref<8x96xf32, #tpu.memory_space<vmem>>, vector<8x4xf32>
    %c0_77 = arith.constant 0 : index
    %c60 = arith.constant 60 : index
    %131 = vector.load %arg6[%c0_77, %c60] : memref<8x96xf32, #tpu.memory_space<vmem>>, vector<8x4xf32>
    %c0_78 = arith.constant 0 : index
    %c92 = arith.constant 92 : index
    %132 = vector.load %arg6[%c0_78, %c92] : memref<8x96xf32, #tpu.memory_space<vmem>>, vector<8x4xf32>
    %cst_79 = arith.constant dense<0.000000e+00> : vector<8x8xf32>
    %133 = tpu.matmul %130, %131, %cst_79 {dimension_numbers = #tpu.dot_dimension_numbers<[1], [1], [0], [0], [0, 0, 1, 0], [], []>} : vector<8x4xf32>, vector<8x4xf32>, vector<8x8xf32> -> vector<8x8xf32>
    %cst_80 = arith.constant 5.000000e-01 : f32
    %134 = vector.broadcast %cst_80 : f32 to vector<8x8xf32>
    %135 = arith.mulf %133, %134 : vector<8x8xf32>
    %cst_81 = arith.constant dense<0xFF800000> : vector<8xf32>
    %136 = vector.multi_reduction <maximumf>, %135, %cst_81 [1] : vector<8x8xf32> to vector<8xf32>
    %137 = vector.shape_cast %136 : vector<8xf32> to vector<8x1xf32>
    %138 = vector.broadcast %137 : vector<8x1xf32> to vector<8x8xf32>
    %139 = arith.subf %135, %138 : vector<8x8xf32>
    %140 = math.exp %139 : vector<8x8xf32>
    %cst_82 = arith.constant dense<0.000000e+00> : vector<8xf32>
    %141 = vector.multi_reduction <add>, %140, %cst_82 [1] : vector<8x8xf32> to vector<8xf32>
    %142 = vector.shape_cast %141 : vector<8xf32> to vector<8x1xf32>
    %cst_83 = arith.constant dense<0.000000e+00> : vector<8x4xf32>
    %143 = tpu.matmul %140, %132, %cst_83 {dimension_numbers = #tpu.dot_dimension_numbers<[1], [0], [0], [1], [0, 0, 1, 1], [], []>} : vector<8x8xf32>, vector<8x4xf32>, vector<8x4xf32> -> vector<8x4xf32>
    %144 = tpu.reciprocal %142 {approx = true} : vector<8x1xf32> -> vector<8x1xf32>
    %145 = vector.broadcast %144 : vector<8x1xf32> to vector<8x4xf32>
    %146 = arith.mulf %143, %145 : vector<8x4xf32>
    %c0_84 = arith.constant 0 : index
    %c28_85 = arith.constant 28 : index
    %147 = vector.load %arg7[%c0_84, %c28_85] : memref<8x32xf32, #tpu.memory_space<vmem>>, vector<8x4xf32>
    tpu.vector_store %arg7[%c0_84, %c28_85], %146 {strides = array<i32>} : memref<8x32xf32, #tpu.memory_space<vmem>>, vector<8x4xf32>,
    %c0_86 = arith.constant 0 : index
    %c0_87 = arith.constant 0 : index
    %148 = vector.load %arg7[%c0_86, %c0_87] : memref<8x32xf32, #tpu.memory_space<vmem>>, vector<8x32xf32>
    %c0_88 = arith.constant 0 : index
    %c0_89 = arith.constant 0 : index
    %149 = vector.load %arg3[%c0_88, %c0_89] : memref<32x32xf32, #tpu.memory_space<vmem>>, vector<32x32xf32>
    %cst_90 = arith.constant dense<0.000000e+00> : vector<8x32xf32>
    %150 = tpu.matmul %148, %149, %cst_90 {dimension_numbers = #tpu.dot_dimension_numbers<[1], [0], [0], [1], [0, 0, 1, 1], [], []>} : vector<8x32xf32>, vector<32x32xf32>, vector<8x32xf32> -> vector<8x32xf32>
    %c0_91 = arith.constant 0 : index
    %c0_92 = arith.constant 0 : index
    %151 = vector.load %arg4[%c0_91, %c0_92] : memref<1x32xf32, #tpu.memory_space<vmem>>, vector<1x32xf32>
    %152 = vector.broadcast %151 : vector<1x32xf32> to vector<8x32xf32>
    %153 = arith.addf %150, %152 : vector<8x32xf32>
    %c0_93 = arith.constant 0 : index
    %c0_94 = arith.constant 0 : index
    %154 = vector.load %arg5[%c0_93, %c0_94] : memref<8x32xf32, #tpu.memory_space<vmem>>, vector<8x32xf32>
    tpu.vector_store %arg5[%c0_93, %c0_94], %153 {strides = array<i32>} : memref<8x32xf32, #tpu.memory_space<vmem>>, vector<8x32xf32>,
    return
  }
  func.func @transform_0(%arg0: i32) -> (i32, i32) {
    %c0_i32 = arith.constant 0 : i32
    %c0_i32_0 = arith.constant 0 : i32
    return %arg0, %c0_i32 : i32, i32
  }
  func.func @transform_1(%arg0: i32) -> (i32, i32) {
    %c0_i32 = arith.constant 0 : i32
    %c0_i32_0 = arith.constant 0 : i32
    %c0_i32_1 = arith.constant 0 : i32
    return %c0_i32, %c0_i32_0 : i32, i32
  }
  func.func @transform_2(%arg0: i32) -> (i32, i32) {
    %c0_i32 = arith.constant 0 : i32
    %c0_i32_0 = arith.constant 0 : i32
    %c0_i32_1 = arith.constant 0 : i32
    return %c0_i32, %c0_i32_0 : i32, i32
  }
  func.func @transform_3(%arg0: i32) -> (i32, i32) {
    %c0_i32 = arith.constant 0 : i32
    %c0_i32_0 = arith.constant 0 : i32
    %c0_i32_1 = arith.constant 0 : i32
    return %c0_i32, %c0_i32_0 : i32, i32
  }
  func.func @transform_4(%arg0: i32) -> (i32, i32) {
    %c0_i32 = arith.constant 0 : i32
    %c0_i32_0 = arith.constant 0 : i32
    return %arg0, %c0_i32 : i32, i32
  }
}

</mosaic_0001>

<bundles_post_ra>
// kernel: tpu_custom_call.1
= control target key start
LH: loop header
LB: loop body
LE: loop exit
PB: predicated region body
PF: predicated region fallthrough
CT: control target
= control target key end

     0   :  { %9 = vsyncpa [#allocation5], 0  ;;  %s2841_s0 = inlined_call_operand.hbm [shape: f32[16,32], index: 0, kind: input, shape index: {}]   ;;  %s2842_s1 = inlined_call_operand.hbm [shape: f32[32,96], index: 1, kind: input, shape index: {}]   ;;  %s2843_s2 = inlined_call_operand.hbm [shape: f32[32,32], index: 2, kind: input, shape index: {}]   ;;  %s2844_s3 = inlined_call_operand.vmem [shape: f32[1,32], index: 3, kind: input, shape index: {}]   ;;  %s2845_s4 = inlined_call_operand.hbm [shape: f32[16,32], index: 4, kind: output, shape index: {}]  }
   0x1   :  { %11 = vsyncpa [#allocation5 + $0x1], 0 }
   0x2   :  { %12 = vsyncpa [#allocation8], 0 }
   0x3   :  { %13 = vsyncpa [#allocation6], 0 }
   0x4   :  { %15 = vsyncpa [#allocation6 + $0x1], 0  ;;  %s2454_s15 = smov 0   ;;  %s2456_s16 = smov 0  }
   0x5   :  { %s2458_s17 = smov 0   ;;  %s2460_s18 = smov 0  }
   0x6 LB: > { %s2475_s19 = sadd.s32 4294967295, %s2388_s18   ;;  %s1899_s20 = sadd.s32 4294967294, %s2388_s18   ;;  %s2388_s18 = sphi %s2460_s18, %s2865_s18   ;;  %s2384_s17 = sphi %s2458_s17, %s2864_s17   ;;  %s2380_s16 = sphi %s2456_s16, %s2863_s16   ;;  %s2376_s15 = sphi %s2454_s15, %s2862_s15  }
   0x7   : > { %p41_p0 = scmp.ne.s32.totalorder %s2380_s16, %s2376_s15  ;;  %p2846_p1 = scmp.eq.s32.totalorder %s2475_s19, 0 }
   0x8   : > { %p134_p3 = scmp.eq.s32.totalorder %s1899_s20, 1  ;;  %p1900_p5 = scmp.ge.s32.totalorder %s2388_s18, 1 }
   0x9   : > { %p2484_p4 = por %p2846_p1, %p41_p0  ;;  %p141_p7 = scmp.lt.s32.totalorder %s2388_s18, 3 }
   0xa   : > { %p2489_p6 = por %p134_p3, %p41_p0  ;;  %s2390_s24 = smov [#allocation7]  }
   0xb   : > { %s2849_s21 = scalar_select %p2484_p4, 1, 0 }
   0xc   : > { %s2850_s22 = scalar_select %p2489_p6, 1, 0 }
   0xd   : > { %p2494_p8 = pnand %p1900_p5, %p141_p7  ;;  %s153_s25 = sshll.u32 %s2390_s24, 4  ;;  %s2498_s25 = int_to_ptr.vmem [resolvable:$true] %s153_s25 }
   0xe   : > { %s2391_s27 = smov [#allocation9]   ;;  %s2232_s5 = scalar_lea.hbm %s2842_s1, 512 }
   0xf   : > { %p2110_p9 = pneg %p2494_p8  ;;  %s166_s28 = sshll.u32 %s2391_s27, 4  ;;  %s2509_s28 = int_to_ptr.vmem [resolvable:$true] %s166_s28 }
  0x10   : > { %p2233_p12 = scmp.ne.s32.totalorder %s2842_s1, %s2232_s5  ;;  %p2239_p5 = scmp.lt.u32.totalorder %s2232_s5, %s2842_s1 }
  0x11   : > { %p2505_p11 = pnand %p2110_p9, %p2846_p1 }
  0x13   : > { %p2234_p13 = pneg %p2505_p11 }
  0x15   : > { %p2235_p0 = pnand %p2234_p13, %p2233_p12 }
  0x17   : > { %p2236_p3 = pneg %p2235_p0 }
  0x19   : > { %p2241_p7 = pnand %p2239_p5, %p2236_p3 }
  0x1b   : > { %2244 = shalt.err (!%p2241_p7)
}
  0x1c   : > { %s2245_s10 = scalar_lea.vmem %s2498_s25, 512  ;;  %p2253_p2 = scmp.lt.s32.totalorder %s2498_s25, %s2498_s25 }
  0x1d   : > { %p2246_p9 = scmp.ne.s32.totalorder %s2498_s25, %s2245_s10  ;;  %p2254_p12 = scmp.lt.s32.totalorder %s2245_s10, %s2245_s10 }
  0x1f   : > { %p2248_p10 = pnand %p2246_p9, %p2234_p13  ;;  %p2255_p0 = por %p2254_p12, %p2253_p2 }
  0x21   : > { %p2249_p1 = pneg %p2248_p10 }
  0x23   : > { %p2256_p6 = pnand %p2255_p0, %p2249_p1 }
  0x25   : > { %2259 = shalt.err (!%p2256_p6)
}
  0x26   : > { %s2392_s11 = smov 128   ;;  %s2393_s12 = smov 8  }
  0x27   : > { %2113 = dma.hbm_to_vmem [thread:$0]  (!%p2505_p11), %s2842_s1, 512, %s2498_s25, [#allocation8], %s2392_s11, %s2392_s11, %s2393_s12  }
  0x28   : > { %s2260_s27 = scalar_lea.hbm %s2843_s2, 512 }
  0x29   : > { %p2261_p2 = scmp.ne.s32.totalorder %s2843_s2, %s2260_s27  ;;  %p2267_p10 = scmp.lt.u32.totalorder %s2260_s27, %s2843_s2 }
  0x2b   : > { %p2263_p1 = pnand %p2261_p2, %p2234_p13 }
  0x2d   : > { %p2264_p6 = pneg %p2263_p1 }
  0x2f   : > { %p2269_p3 = pnand %p2267_p10, %p2264_p6 }
  0x31   : > { %2272 = shalt.err (!%p2269_p3)
}
  0x32   : > { %s2273_s25 = scalar_lea.vmem %s2509_s28, 512  ;;  %p2281_p12 = scmp.lt.s32.totalorder %s2509_s28, %s2509_s28 }
  0x33   : > { %p2274_p5 = scmp.ne.s32.totalorder %s2509_s28, %s2273_s25  ;;  %p2282_p0 = scmp.lt.s32.totalorder %s2273_s25, %s2273_s25 }
  0x35   : > { %p2276_p7 = pnand %p2274_p5, %p2234_p13  ;;  %p2283_p2 = por %p2282_p0, %p2281_p12 }
  0x37   : > { %p2277_p9 = pneg %p2276_p7 }
  0x39   : > { %p2284_p1 = pnand %p2283_p2, %p2277_p9 }
  0x3b   : > { %2287 = shalt.err (!%p2284_p1)
}
  0x3c   : > { %2116 = dma.hbm_to_vmem [thread:$0]  (!%p2505_p11), %s2843_s2, 512, %s2509_s28, [#allocation8], %s2392_s11, %s2392_s11, %s2393_s12  }
  0x3d   : > { %s2564_s9 = sadd.s32 1, %s2388_s18   ;;  %s28_s26 = sadd.s32 1, %s2384_s17 }
  0x3e   : > { %s25_s10 = ssub.s32 %s2388_s18, %s2564_s9  ;;  %p35_p13 = scmp.ne.s32.totalorder %s2384_s17, %s2380_s16 }
  0x3f   : > { %p26_p6 = scmp.eq.s32.totalorder %s25_s10, 0  ;;  %p36_p10 = scmp.eq.s32.totalorder %s2388_s18, 0 }
  0x40   : > { %p2853_p3 = scmp.eq.s32.totalorder %s2475_s19, 1  ;;  %p2127_p7 = scmp.lt.s32.totalorder %s2388_s18, 2 }
  0x41   : > { %s2580_s14 = scalar_select %p26_p6, %s2384_s17, %s28_s26  }
  0x42   : > { %p2574_p5 = por %p2853_p3, %p35_p13  ;;  %p37_p9 = por %p36_p10, %p35_p13 }
  0x43   : > { %s183_s20 = sand.u32 1, %s2384_s17   ;;  %s1905_s28 = sshll.u32 %s2388_s18, 7 }
  0x44   : > { %s2854_s13 = scalar_select %p2574_p5, 1, 0 }
  0x45   : > { %s1904_s24 = sshll.u32 %s183_s20, 3  ;;  %s2587_s27 = scalar_lea.hbm %s2841_s0, %s1905_s28 }
  0x46   : > { %s187_s29 = scalar_lea.vmem [#allocation4], %s1904_s24  ;;  %p2591_p11 = pnand %p2127_p7, %p37_p9 }
  0x47   : > { %s194_s30 = sshll.u32 %s187_s29, 4  ;;  %s184_s6 = scalar_lea.sflag [#allocation5], %s183_s20  ;;  %s2589_s30 = int_to_ptr.vmem [resolvable:$true] %s194_s30 }
  0x48   : > { %s2288_s25 = scalar_lea.hbm %s2587_s27, 128  ;;  %p2290_p0 = pneg %p2591_p11 }
  0x49   : > { %p2289_p12 = scmp.ne.s32.totalorder %s2587_s27, %s2288_s25  ;;  %s2293_s26 = scalar_lea.hbm %s2841_s0, 256 }
  0x4a   : > { %p2294_p13 = scmp.lt.u32.totalorder %s2587_s27, %s2841_s0  ;;  %p2295_p6 = scmp.lt.u32.totalorder %s2293_s26, %s2288_s25 }
  0x4b   : > { %p2291_p2 = pnand %p2290_p0, %p2289_p12  ;;  %p2297_p3 = scmp.lt.u32.totalorder %s2288_s25, %s2587_s27 }
  0x4c   : > { %p2296_p10 = por %p2295_p6, %p2294_p13 }
  0x4d   : > { %p2292_p1 = pneg %p2291_p2 }
  0x4e   : > { %p2298_p7 = por %p2297_p3, %p2296_p10 }
  0x50   : > { %p2299_p9 = pnand %p2298_p7, %p2292_p1 }
  0x52   : > { %2302 = shalt.err (!%p2299_p9)
}
  0x53   : > { %s2303_s20 = scalar_lea.vmem %s2589_s30, 128  ;;  %s2394_s28 = smov [#allocation4]  }
  0x54   : > { %p2304_p12 = scmp.ne.s32.totalorder %s2589_s30, %s2303_s20  ;;  %s2308_s11 = sshll.u32 %s2394_s28, 4  ;;  %s2309_s11 = int_to_ptr.vmem [resolvable:$false] %s2308_s11 }
  0x55   : > { %s2310_s12 = scalar_lea.vmem %s2309_s11, 256  ;;  %p2311_p4 = scmp.lt.s32.totalorder %s2589_s30, %s2309_s11 }
  0x56   : > { %p2306_p2 = pnand %p2304_p12, %p2290_p0  ;;  %p2312_p13 = scmp.lt.s32.totalorder %s2310_s12, %s2303_s20 }
  0x58   : > { %p2307_p5 = pneg %p2306_p2  ;;  %p2313_p6 = por %p2312_p13, %p2311_p4 }
  0x5a   : > { %p2314_p10 = pnand %p2313_p6, %p2307_p5 }
  0x5c   : > { %2317 = shalt.err (!%p2314_p10)
}
  0x5d   : > { %2120 = dma.hbm_to_vmem [thread:$0]  (!%p2591_p11), %s2587_s27, 128, %s2589_s30, %s184_s6  }
  0x5e   : > { %203 = sbr.rel (%p2494_p8) target bundleno = 1790 (0x6fe), region = 36  ;;  %s2623_s29 = sand.u32 (!%p2494_p8), 1, %s2380_s16  }
  0x5f   : > { %s1907_s25 = sshll.u32 (!%p2494_p8), %s2623_s29, 3  ;;  %s206_s7 = scalar_lea.sflag (!%p2494_p8), [#allocation5], %s2623_s29 }
  0x60   : > { %s209_s8 = scalar_lea.vmem (!%p2494_p8), [#allocation4], %s1907_s25  ;;  %p2856_p4 = scmp.ne.s32.totalorder (!%p2494_p8), %s2849_s21, 0 }
  0x65   : > { %2363 = dma.done.wait (%p2856_p4), %s206_s7, 128  }
  0x66   : > { %2365 = vsyncadd (%p2856_p4), %s206_s7, 4294967168  ;;  %p2857_p5 = scmp.eq.s32.totalorder %s2475_s19, 0 }
  0x68   : > { %2367 = dma.done.wait (%p2857_p5), [#allocation8], 1024   ;;  %p2858_p8 = pmov %p2857_p5 }
  0x69   : > { %v2395_v0 = vmov 0.0|0.0   ;;  %vm2396_vm0 = vmmov 0   ;;  %v2397_v1 = vmov 0.0   ;;  %v243_v2 = vld [vmem:[#allocation7] sm:$0xff]  ;;  %v244_v3 = vld [vmem:[#allocation7 + $0x8] sm:$0xff]  ;;  %v245_v4 = vld [vmem:[#allocation7 + $0x10] sm:$0xff] }
  0x6a   : > { %2369 = vsyncadd (%p2858_p8), [#allocation8], 4294966272  ;;  %2086 = vmatprep.subr.bf16.mxu0 %v2395_v0  ;;  %1992 = vmatprep.mubr.msk.f32.mxu0 %vm2396_vm0, %v2397_v1  ;;  %v2087_v5 = vpack.c.bf16 %v244_v3, %v243_v2  ;;  %v246_v6 = vld [vmem:[#allocation7 + $0x18] sm:$0xff]  ;;  %vm247_vm1 = vcmask 261120   ;;  %vm321_vm2 = vcmask 785408   ;;  %s2398_s21 = smov 64  }
  0x6b   : > { %1995 = vmatprep.subr.mxu1 %v2397_v1  ;;  %1997 = vmatprep.mubr.msk.f32.mxu1 %vm2396_vm0, %v2397_v1  ;;  %v2090_v7 = vpack.c.bf16 %v246_v6, %v245_v4  ;;  %v242_v8 = vld [vmem:[%s209_s8] sm:$0xff]  ;;  %s2399_s23 = smov 96   ;;  %s2400_s27 = smov 92   ;;  %vm327_vm3 = vcmask 31744   ;;  %vm403_vm4 = vcmask 64512   ;;  %vm664_vm5 = vcmask 64544  }
  0x6c   : > { %2088 = vmatpush3.bf16.msra.mxu0 %v2087_v5  ;;  %s2401_s30 = smov 124   ;;  %s2402_s5 = smov 88   ;;  %vm838_vm6 = vcmask 97344   ;;  %vm1012_vm7 = vcmask 130144   ;;  %vm1186_vm8 = vcmask 162944   ;;  %vm1360_vm9 = vcmask 195744  }
  0x6d   : > { %2089 = vmatprep.subr.bf16.mxu0 %v2395_v0  ;;  %s2403_s6 = smov 120   ;;  %s2404_s26 = smov 84   ;;  %vm1534_vm10 = vcmask 228544   ;;  %vm1708_vm11 = vcmask 261344  }
  0x6e   : > { %s2405_s10 = smov 116   ;;  %s2406_s24 = smov 80  }
  0x6f   : > { %s2407_s20 = smov 112   ;;  %s2408_s28 = smov 108  }
  0x70   : > { %2091 = vmatpush3.bf16.msra.mxu0 %v2090_v7  ;;  %s2409_s11 = smov 72   ;;  %s2410_s12 = smov 104  }
  0x71   : > { %2015 = vmatprep.subr.mxu0 %v2397_v1  ;;  %s2411_s7 = smov 68   ;;  %s2412_s8 = smov 100  }
  0x72   : > { %p2859_p0 = scmp.ne.s32.totalorder %s2854_s13, 0 }
  0x73   : > { %1993 = vmatmul.mubr.msk.f32.vlgmr.msra.gmra.mrb[0].mxu0 %vm247_vm1, %v242_v8 }
  0x74   : > { %2017 = vmatprep.mubr.msk.f32.mxu0 %vm2396_vm0, %v2397_v1 }
 0x146   : > { %v317_v9 = vpop.f32.mrb[0].mxu0 }
 0x147   : > { %322 = vst.msk [vmem:[#allocation2] sm:$0xff] %vm321_vm2, %v317_v9  ;;  %v1994_v10 = vpop.f32.mrb[1].mxu0 }
 0x14e   : > { %v2648_v11 = vld [vmem:[#allocation2] sm:$0xff] }
 0x14f   : > { %413 = vrot.lane.b32.xlu1 %v2648_v11, %s2398_s21  ;;  %325 = vrot.lane.b32.xlu0 %v2648_v11, %s2399_s23  ;;  %s2413_s21 = smov 56   ;;  %s2414_s23 = smov 76  }
 0x153   : > { %496 = vrot.lane.b32.xlu1 %v2648_v11, %s2400_s27  ;;  %s2415_s27 = smov 60  }
 0x157   : > { %494 = vrot.lane.b32.xlu1 %v2648_v11, %s2401_s30  ;;  %s2416_s30 = smov 44  }
 0x15b   : > { %670 = vrot.lane.b32.xlu1 %v2648_v11, %s2402_s5  ;;  %s2417_s5 = smov 52  }
 0x15f   : > { %668 = vrot.lane.b32.xlu1 %v2648_v11, %s2403_s6  ;;  %s2418_s6 = smov 36  }
 0x163   : > { %844 = vrot.lane.b32.xlu1 %v2648_v11, %s2404_s26  ;;  %s2419_s26 = smov 48  }
 0x167   : > { %842 = vrot.lane.b32.xlu1 %v2648_v11, %s2405_s10  ;;  %s2420_s10 = smov 40  }
 0x16b   : > { %1018 = vrot.lane.b32.xlu1 %v2648_v11, %s2406_s24  ;;  %s2421_s24 = smov 4  }
 0x16f   : > { %1016 = vrot.lane.b32.xlu1 %v2648_v11, %s2407_s20  ;;  %s2422_s20 = smov 8  }
 0x173   : > { %1190 = vrot.lane.b32.xlu1 %v2648_v11, %s2408_s28  ;;  %s2423_s28 = smov 12  }
 0x177   : > { %1366 = vrot.lane.b32.xlu1 %v2648_v11, %s2409_s11  ;;  %s2424_s11 = smov 16  }
 0x17b   : > { %1364 = vrot.lane.b32.xlu1 %v2648_v11, %s2410_s12  ;;  %s2425_s12 = smov 20  }
 0x17f   : > { %1540 = vrot.lane.b32.xlu1 %v2648_v11, %s2411_s7  ;;  %s2426_s7 = smov 24  }
 0x183   : > { %1538 = vrot.lane.b32.xlu1 %v2648_v11, %s2412_s8  ;;  %s2427_s8 = smov 28  }
 0x187   : > { %756 = vrot.lane.b32.xlu1 %v2648_v11, %s2413_s21 }
 0x1c1   : > { %v414_v12 = vpop.permute.xlu1 %413  ;;  %v326_v13 = vpop.permute.xlu0 %325 }
 0x1c2   : > { %1996 = vmatpush3.xpose.msk.msra.mxu1 %vm327_vm3, %v326_v13 }
 0x1c3   : > { %2000 = vmatprep.subr.mxu1 %v2397_v1 }
 0x1c5   : > { %v2668_v14 = vpop.permute.xlu1 %496  ;;  %1998 = vmatmul.mubr.msk.f32.vlgmr.msra.gmra.mrb[0].mxu1 %vm327_vm3, %v2648_v11 }
 0x1c6   : > { %2001 = vmatpush3.msra.mxu1 %v414_v12  ;;  %2002 = vmatprep.mubr.msk.f32.mxu1 %vm2396_vm0, %v2397_v1 }
 0x1c7   : > { %2005 = vmatprep.subr.mxu1 %v2397_v1 }
 0x1c9   : > { %v2675_v15 = vpop.permute.xlu1 %494 }
 0x1cd   : > { %v671_v16 = vpop.permute.xlu1 %670 }
 0x1ce   : > { %2016 = vmatpush3.xpose.msk.msra.mxu0 %vm327_vm3, %v671_v16 }
 0x1cf   : > { %2025 = vmatprep.subr.mxu0 %v2397_v1 }
 0x1d1   : > { %v669_v17 = vpop.permute.xlu1 %668 }
 0x1d2   : > { %2018 = vmatmul.mubr.msk.f32.vlgmr.msra.gmra.mrb[2].mxu0 %vm327_vm3, %v669_v17 }
 0x1d3   : > { %2027 = vmatprep.mubr.msk.f32.mxu0 %vm2396_vm0, %v2397_v1 }
 0x1d5   : > { %v845_v18 = vpop.permute.xlu1 %844 }
 0x1d6   : > { %2026 = vmatpush3.xpose.msk.msra.mxu0 %vm327_vm3, %v845_v18 }
 0x1d7   : > { %2035 = vmatprep.subr.mxu0 %v2397_v1 }
 0x1d9   : > { %v843_v19 = vpop.permute.xlu1 %842 }
 0x1da   : > { %2028 = vmatmul.mubr.msk.f32.vlgmr.msra.gmra.mrb[4].mxu0 %vm327_vm3, %v843_v19 }
 0x1db   : > { %2037 = vmatprep.mubr.msk.f32.mxu0 %vm2396_vm0, %v2397_v1 }
 0x1dd   : > { %v1019_v20 = vpop.permute.xlu1 %1018 }
 0x1de   : > { %2036 = vmatpush3.xpose.msk.msra.mxu0 %vm327_vm3, %v1019_v20 }
 0x1df   : > { %2045 = vmatprep.subr.mxu0 %v2397_v1 }
 0x1e1   : > { %v1017_v21 = vpop.permute.xlu1 %1016 }
 0x1e2   : > { %2038 = vmatmul.mubr.msk.f32.vlgmr.msra.gmra.mrb[6].mxu0 %vm327_vm3, %v1017_v21 }
 0x1e3   : > { %2047 = vmatprep.mubr.msk.f32.mxu0 %vm2396_vm0, %v2397_v1 }
 0x1e5   : > { %v1191_v38 = vpop.permute.xlu1 %1190 }
 0x1e9   : > { %v1367_v39 = vpop.permute.xlu1 %1366 }
 0x1ed   : > { %v1365_v42 = vpop.permute.xlu1 %1364 }
 0x1f1   : > { %v1541_v45 = vpop.permute.xlu1 %1540 }
 0x1f5   : > { %v1539_v47 = vpop.permute.xlu1 %1538 }
 0x1f9   : > { %v757_v20 = vpop.permute.xlu1 %756 }
 0x298   : > { %v398_v22 = vpop.f32.mrb[0].mxu1 }
 0x299   : > { %v402_v23 = vmul.f32 0.5, %v398_v22  ;;  %v1999_v24 = vpop.f32.mrb[1].mxu1 }
 0x29b   : > { %v404_v25 = vsel %vm403_vm4, %v402_v23, -inf }
 0x29c   : > { %405 = vmax.xlane.f32.xlu0 %v404_v25 }
 0x2a5   : > { %v742_v26 = vpop.f32.mrb[2].mxu0 }
 0x2a6   : > { %v2019_v27 = vpop.f32.mrb[3].mxu0  ;;  %v2695_v32 = vmul.f32 0.5, %v742_v26 }
 0x2a8   : > { %v747_v34 = vsel %vm403_vm4, %v2695_v32, -inf }
 0x2ad   : > { %v916_v28 = vpop.f32.mrb[4].mxu0 }
 0x2ae   : > { %v2029_v29 = vpop.f32.mrb[5].mxu0  ;;  %v2697_v33 = vmul.f32 0.5, %v916_v28 }
 0x2b0   : > { %v921_v36 = vsel %vm403_vm4, %v2697_v33, -inf }
 0x2b2   : > { %1192 = vrot.lane.b32.xlu0 %v2648_v11, %s2414_s23 }
 0x2b5   : > { %v1090_v30 = vpop.f32.mrb[6].mxu0 }
 0x2b6   : > { %582 = vrot.lane.b32.xlu0 %v2648_v11, %s2415_s27  ;;  %v2039_v31 = vpop.f32.mrb[7].mxu0  ;;  %v2701_v35 = vmul.f32 0.5, %v1090_v30  ;;  %s1939_s27 = sshll.u32 %s2475_s19, 7 }
 0x2b8   : > { %v1095_v37 = vsel %vm403_vm4, %v2701_v35, -inf }
 0x2d5   : > { %748 = vmax.xlane.f32.xlu0 %v747_v34 }
 0x2d9   : > { %922 = vmax.xlane.f32.xlu0 %v921_v36 }
 0x2dd   : > { %1096 = vmax.xlane.f32.xlu0 %v1095_v37 }
 0x329   : > { %v406_v40 = vpop.xlane.xlu0 %405 }
 0x32a   : > { %v407_v41 = vsub.f32 %v402_v23, %v406_v40 }
 0x32c   : > { %v408_v43 = vmul.f32 1.442695, %v407_v41 }
 0x32d   : > { %v1193_v44 = vpop.permute.xlu0 %1192 }
 0x32e   : > { %2200 = vpow2.f32 %v408_v43  ;;  %2046 = vmatpush3.xpose.msk.msra.mxu0 %vm327_vm3, %v1193_v44 }
 0x32f   : > { %2055 = vmatprep.subr.mxu0 %v2397_v1 }
 0x331   : > { %2048 = vmatmul.mubr.msk.f32.vlgmr.msra.gmra.mrb[8].mxu0 %vm327_vm3, %v1191_v38  ;;  %v583_v48 = vpop.permute.xlu0 %582 }
 0x332   : > { %2056 = vmatpush3.xpose.msk.msra.mxu0 %vm327_vm3, %v1367_v39  ;;  %2057 = vmatprep.mubr.msk.f32.mxu0 %vm2396_vm0, %v2397_v1 }
 0x333   : > { %2065 = vmatprep.subr.mxu0 %v2397_v1 }
 0x335   : > { %2058 = vmatmul.mubr.msk.f32.vlgmr.msra.gmra.mrb[10].mxu0 %vm327_vm3, %v1365_v42 }
 0x336   : > { %2066 = vmatpush3.xpose.msk.msra.mxu0 %vm327_vm3, %v1541_v45  ;;  %2067 = vmatprep.mubr.msk.f32.mxu0 %vm2396_vm0, %v2397_v1 }
 0x337   : > { %2092 = vmatprep.subr.bf16.mxu0 %v2395_v0 }
 0x338   : > { %v2719_v46 = vpop.eup %2200 }
 0x339   : > { %2003 = vmatmul.mubr.msk.f32.vlgmr.msra.gmra.mrb[2].mxu1 %vm403_vm4, %v2719_v46  ;;  %2068 = vmatmul.mubr.msk.f32.vlgmr.msra.gmra.mrb[12].mxu0 %vm327_vm3, %v1539_v47 }
 0x33a   : > { %2006 = vmatpush3.xpose.msk.msra.mxu1 %vm327_vm3, %v2668_v14  ;;  %2007 = vmatprep.mubr.msk.f32.mxu1 %vm2396_vm0, %v2397_v1 }
 0x33b   : > { %2010 = vmatprep.subr.mxu1 %v2397_v1  ;;  %2083 = vmatprep.mubr.msk.f32.mxu0 %vm2396_vm0, %v2397_v1 }
 0x33d   : > { %2008 = vmatmul.mubr.msk.f32.vlgmr.msra.gmra.mrb[4].mxu1 %vm327_vm3, %v2675_v15 }
 0x33e   : > { %2011 = vmatpush3.msra.mxu1 %v583_v48  ;;  %2012 = vmatprep.mubr.msk.f32.mxu1 %vm2396_vm0, %v2397_v1 }
 0x33f   : > { %2020 = vmatprep.subr.mxu1 %v2397_v1 }
 0x362   : > { %v749_v5 = vpop.xlane.xlu0 %748 }
 0x363   : > { %v750_v7 = vsub.f32 %v2695_v32, %v749_v5 }
 0x365   : > { %v751_v8 = vmul.f32 1.442695, %v750_v7 }
 0x366   : > { %v923_v6 = vpop.xlane.xlu0 %922 }
 0x367   : > { %v924_v9 = vsub.f32 %v2697_v33, %v923_v6  ;;  %2202 = vpow2.f32 %v751_v8 }
 0x369   : > { %v925_v12 = vmul.f32 1.442695, %v924_v9 }
 0x36a   : > { %v1097_v10 = vpop.xlane.xlu0 %1096 }
 0x36b   : > { %v1098_v13 = vsub.f32 %v2701_v35, %v1097_v10  ;;  %2204 = vpow2.f32 %v925_v12  ;;  %v410_v35 = vsel %vm403_vm4, %v2719_v46, 0.0  ;;  %v1711_v10 = vld [vmem:[#allocation9] sm:$0xff]  ;;  %v1712_v12 = vld [vmem:[#allocation9 + $0x8] sm:$0xff] }
 0x36d   : > { %v1099_v14 = vmul.f32 1.442695, %v1098_v13  ;;  %v2093_v13 = vpack.c.bf16 %v1712_v12, %v1711_v10 }
 0x36f   : > { %2206 = vpow2.f32 %v1099_v14  ;;  %v1713_v14 = vld [vmem:[#allocation9 + $0x10] sm:$0xff]  ;;  %2094 = vmatpush3.bf16.msra.mxu0 %v2093_v13 }
 0x370   : > { %2095 = vmatprep.subr.bf16.mxu0 %v2395_v0 }
 0x371   : > { %v2203_v15 = vpop.eup %2202 }
 0x372   : > { %v753_v16 = vsel %vm403_vm4, %v2203_v15, 0.0 }
 0x375   : > { %v2205_v17 = vpop.eup %2204 }
 0x379   : > { %v2207_v18 = vpop.eup %2206 }
 0x37a   : > { %v1101_v19 = vsel %vm403_vm4, %v2207_v18, 0.0 }
 0x404   : > { %v1264_v49 = vpop.f32.mrb[8].mxu0 }
 0x405   : > { %v1268_v50 = vmul.f32 0.5, %v1264_v49  ;;  %v2049_v51 = vpop.f32.mrb[9].mxu0 }
 0x407   : > { %v1269_v52 = vsel %vm403_vm4, %v1268_v50, -inf }
 0x408   : > { %1270 = vmax.xlane.f32.xlu1 %v1269_v52  ;;  %v1438_v53 = vpop.f32.mrb[10].mxu0 }
 0x409   : > { %v1442_v54 = vmul.f32 0.5, %v1438_v53  ;;  %v2059_v55 = vpop.f32.mrb[11].mxu0 }
 0x40b   : > { %v1443_v56 = vsel %vm403_vm4, %v1442_v54, -inf }
 0x40c   : > { %v2738_v57 = vpop.f32.mrb[2].mxu1  ;;  %1444 = vmax.xlane.f32.xlu0 %v1443_v56  ;;  %v1612_v58 = vpop.f32.mrb[12].mxu0 }
 0x40d   : > { %v1616_v59 = vmul.f32 0.5, %v1612_v58  ;;  %v2004_v60 = vpop.f32.mrb[3].mxu1  ;;  %v2069_v61 = vpop.f32.mrb[13].mxu0 }
 0x40f   : > { %v1617_v62 = vsel %vm403_vm4, %v1616_v59, -inf }
 0x410   : > { %v568_v63 = vpop.f32.mrb[4].mxu1  ;;  %1618 = vmax.xlane.f32.xlu1 %v1617_v62 }
 0x411   : > { %v572_v2 = vmul.f32 0.5, %v568_v63  ;;  %v2009_v3 = vpop.f32.mrb[5].mxu1 }
 0x413   : > { %v573_v4 = vsel %vm403_vm4, %v572_v2, -inf }
 0x414   : > { %574 = vmax.xlane.f32.xlu1 %v573_v4 }
 0x422   : > { %1278 = vrot.lane.b32.xlu0 %v2648_v11, %s2416_s30  ;;  %s241_s30 = scalar_lea.vmem [#allocation10], %s1907_s25  ;;  %s2428_s25 = smov [#allocation10]  }
 0x425   : > { %930 = vrot.lane.b32.xlu1 %v2648_v11, %s2417_s5  ;;  %s1810_s5 = sshll.u32 %s241_s30, 4  ;;  %s2798_s5 = int_to_ptr.vmem [resolvable:$true] %s1810_s5 }
 0x426   : > { %1626 = vrot.lane.b32.xlu0 %v2648_v11, %s2418_s6  ;;  %s2318_s19 = scalar_lea.vmem %s2798_s5, 128 }
 0x427   : > { %p2319_p11 = scmp.ne.s32.totalorder %s2798_s5, %s2318_s19 }
 0x429   : > { %1104 = vrot.lane.b32.xlu1 %v2648_v11, %s2419_s26  ;;  %p2320_p1 = pnand %p2319_p11, %p2859_p0 }
 0x42b   : > { %p2321_p3 = pneg %p2320_p1 }
 0x42d   : > { %1452 = vrot.lane.b32.xlu1 %v2648_v11, %s2420_s10  ;;  %v927_v11 = vsel %vm403_vm4, %v2205_v17, 0.0  ;;  %s2796_s10 = scalar_lea.hbm %s2845_s4, %s1939_s27 }
 0x445   : > { %754 = vadd.xlane.f32.xlu0 %v753_v16 }
 0x449   : > { %928 = vadd.xlane.f32.xlu0 %v927_v11 }
 0x44d   : > { %1102 = vadd.xlane.f32.xlu0 %v1101_v19 }
 0x495   : > { %v1271_v21 = vpop.xlane.xlu1 %1270 }
 0x496   : > { %v1272_v26 = vsub.f32 %v1268_v50, %v1271_v21 }
 0x498   : > { %v1273_v29 = vmul.f32 1.442695, %v1272_v26 }
 0x499   : > { %v1445_v22 = vpop.xlane.xlu0 %1444 }
 0x49a   : > { %v1446_v23 = vsub.f32 %v1442_v54, %v1445_v22 }
 0x49c   : > { %v1447_v24 = vmul.f32 1.442695, %v1446_v23 }
 0x49d   : > { %v1619_v25 = vpop.xlane.xlu1 %1618  ;;  %v1279_v44 = vpop.permute.xlu0 %1278 }
 0x49e   : > { %2208 = vpow2.f32 %v1447_v24  ;;  %v1620_v30 = vsub.f32 %v1616_v59, %v1619_v25 }
 0x4a0   : > { %v1621_v33 = vmul.f32 1.442695, %v1620_v30 }
 0x4a1   : > { %v575_v27 = vpop.xlane.xlu1 %574  ;;  %v1627_v46 = vpop.permute.xlu0 %1626 }
 0x4a2   : > { %v576_v28 = vsub.f32 %v572_v2, %v575_v27 }
 0x4a4   : > { %v577_v31 = vmul.f32 1.442695, %v576_v28 }
 0x4a5   : > { %v931_v39 = vpop.permute.xlu1 %930 }
 0x4a6   : > { %2210 = vpow2.f32 %v577_v31 }
 0x4a7   : > { %2212 = vpow2.f32 %v1273_v29 }
 0x4a8   : > { %v2209_v32 = vpop.eup %2208  ;;  %2214 = vpow2.f32 %v1621_v33 }
 0x4a9   : > { %v1449_v34 = vsel %vm403_vm4, %v2209_v32, 0.0  ;;  %v1105_v42 = vpop.permute.xlu1 %1104 }
 0x4aa   : > { %1450 = vadd.xlane.f32.xlu0 %v1449_v34 }
 0x4ad   : > { %v1453_v45 = vpop.permute.xlu1 %1452 }
 0x4ae   : > { %411 = vadd.xlane.f32.xlu0 %v410_v35  ;;  %v1936_v35 = vld [vmem:[%s2844_s3] ss:$0 sm:$0xff] }
 0x4b0   : > { %v2211_v36 = vpop.eup %2210 }
 0x4b1   : > { %2013 = vmatmul.mubr.msk.f32.vlgmr.msra.gmra.mrb[6].mxu1 %vm403_vm4, %v2211_v36  ;;  %v579_v37 = vsel %vm403_vm4, %v2211_v36, 0.0  ;;  %v2213_v38 = vpop.eup %2212 }
 0x4b2   : > { %2021 = vmatpush3.msra.mxu1 %v757_v20  ;;  %580 = vadd.xlane.f32.xlu1 %v579_v37  ;;  %v1275_v40 = vsel %vm403_vm4, %v2213_v38, 0.0  ;;  %v2215_v41 = vpop.eup %2214 }
 0x4b3   : > { %2022 = vmatprep.mubr.msk.f32.mxu1 %vm2396_vm0, %v2397_v1  ;;  %2030 = vmatprep.subr.mxu1 %v2397_v1  ;;  %v1623_v43 = vsel %vm403_vm4, %v2215_v41, 0.0 }
 0x4b5   : > { %2023 = vmatmul.mubr.msk.f32.vlgmr.msra.gmra.mrb[8].mxu1 %vm403_vm4, %v2203_v15  ;;  %v1714_v15 = vld [vmem:[#allocation9 + $0x18] sm:$0xff] }
 0x4b6   : > { %2031 = vmatpush3.msra.mxu1 %v931_v39  ;;  %1276 = vadd.xlane.f32.xlu1 %v1275_v40  ;;  %v2096_v11 = vpack.c.bf16 %v1714_v15, %v1713_v14 }
 0x4b7   : > { %2032 = vmatprep.mubr.msk.f32.mxu1 %vm2396_vm0, %v2397_v1  ;;  %2040 = vmatprep.subr.mxu1 %v2397_v1 }
 0x4b8   : > { %2097 = vmatpush3.bf16.msra.mxu0 %v2096_v11 }
 0x4b9   : > { %2033 = vmatmul.mubr.msk.f32.vlgmr.msra.gmra.mrb[10].mxu1 %vm403_vm4, %v2205_v17 }
 0x4ba   : > { %2041 = vmatpush3.msra.mxu1 %v1105_v42  ;;  %1624 = vadd.xlane.f32.xlu1 %v1623_v43 }
 0x4bb   : > { %2042 = vmatprep.mubr.msk.f32.mxu1 %vm2396_vm0, %v2397_v1  ;;  %2050 = vmatprep.subr.mxu1 %v2397_v1 }
 0x4bd   : > { %2043 = vmatmul.mubr.msk.f32.vlgmr.msra.gmra.mrb[12].mxu1 %vm403_vm4, %v2207_v18 }
 0x4be   : > { %2051 = vmatpush3.msra.mxu1 %v1279_v44  ;;  %2052 = vmatprep.mubr.msk.f32.mxu1 %vm2396_vm0, %v2397_v1 }
 0x4bf   : > { %2060 = vmatprep.subr.mxu1 %v2397_v1 }
 0x4c1   : > { %2053 = vmatmul.mubr.msk.f32.vlgmr.msra.gmra.mrb[14].mxu1 %vm403_vm4, %v2213_v38 }
 0x4c2   : > { %2061 = vmatpush3.msra.mxu1 %v1453_v45  ;;  %2062 = vmatprep.mubr.msk.f32.mxu1 %vm2396_vm0, %v2397_v1 }
 0x4c3   : > { %2070 = vmatprep.subr.mxu1 %v2397_v1 }
 0x4c5   : > { %2063 = vmatmul.mubr.msk.f32.vlgmr.msra.gmra.mrb[16].mxu1 %vm403_vm4, %v2209_v32 }
 0x4c6   : > { %2071 = vmatpush3.msra.mxu1 %v1627_v46  ;;  %2072 = vmatprep.mubr.msk.f32.mxu1 %vm2396_vm0, %v2397_v1 }
 0x4c9   : > { %2073 = vmatmul.mubr.msk.f32.vlgmr.msra.gmra.mrb[18].mxu1 %vm403_vm4, %v2215_v41 }
 0x4d2   : > { %v755_v47 = vpop.xlane.xlu0 %754 }
 0x4d6   : > { %v929_v48 = vpop.xlane.xlu0 %928 }
 0x4da   : > { %v1103_v49 = vpop.xlane.xlu0 %1102 }
 0x537   : > { %v1451_v50 = vpop.xlane.xlu0 %1450 }
 0x53b   : > { %v412_v51 = vpop.xlane.xlu0 %411 }
 0x53c   : > { %2216 = vrcp.f32 %v412_v51 }
 0x53f   : > { %v581_v54 = vpop.xlane.xlu1 %580 }
 0x540   : > { %2218 = vrcp.f32 %v581_v54 }
 0x541   : > { %2220 = vrcp.f32 %v755_v47 }
 0x542   : > { %2222 = vrcp.f32 %v929_v48 }
 0x543   : > { %2224 = vrcp.f32 %v1103_v49  ;;  %v1277_v59 = vpop.xlane.xlu1 %1276 }
 0x544   : > { %2226 = vrcp.f32 %v1277_v59 }
 0x545   : > { %2228 = vrcp.f32 %v1451_v50 }
 0x546   : > { %v2217_v52 = vpop.eup %2216 }
 0x547   : > { %v490_v53 = vmul.f32 %v2217_v52, %v2738_v57  ;;  %v1625_v5 = vpop.xlane.xlu1 %1624 }
 0x548   : > { %2230 = vrcp.f32 %v1625_v5 }
 0x549   : > { %491 = vst.msk [vmem:[#allocation3] sm:$0xff] %vm327_vm3, %v490_v53 }
 0x54a   : > { %v2219_v55 = vpop.eup %2218 }
 0x54b   : > { %v2221_v60 = vpop.eup %2220 }
 0x54c   : > { %v2223_v57 = vpop.eup %2222 }
 0x54d   : > { %v2225_v6 = vpop.eup %2224 }
 0x54e   : > { %v2227_v16 = vpop.eup %2226 }
 0x54f   : > { %v2229_v20 = vpop.eup %2228 }
 0x552   : > { %v2231_v24 = vpop.eup %2230 }
 0x584   : > { %v654_v56 = vpop.f32.mrb[6].mxu1 }
 0x585   : > { %v659_v1 = vmul.f32 %v2219_v55, %v654_v56  ;;  %v2014_v58 = vpop.f32.mrb[7].mxu1 }
 0x587   : > { %661 = vrot.lane.b32.xlu1 %v659_v1, %s2421_s24  ;;  %s1797_s24 = scalar_lea.sflag [#allocation6], %s2623_s29 }
 0x588   : > { %v828_v61 = vpop.f32.mrb[8].mxu1 }
 0x589   : > { %v833_v62 = vmul.f32 %v2221_v60, %v828_v61  ;;  %v2024_v63 = vpop.f32.mrb[9].mxu1 }
 0x58b   : > { %835 = vrot.lane.b32.xlu0 %v833_v62, %s2422_s20  ;;  %s2322_s20 = sshll.u32 %s2428_s25, 4  ;;  %s2323_s20 = int_to_ptr.vmem [resolvable:$false] %s2322_s20 }
 0x58c   : > { %v1002_v2 = vpop.f32.mrb[10].mxu1  ;;  %p2325_p7 = scmp.lt.s32.totalorder %s2798_s5, %s2323_s20 }
 0x58d   : > { %v1007_v3 = vmul.f32 %v2223_v57, %v1002_v2  ;;  %v2034_v4 = vpop.f32.mrb[11].mxu1 }
 0x58f   : > { %1009 = vrot.lane.b32.xlu1 %v1007_v3, %s2423_s28  ;;  %s2324_s28 = scalar_lea.vmem %s2323_s20, 256 }
 0x590   : > { %v1176_v7 = vpop.f32.mrb[12].mxu1  ;;  %p2326_p9 = scmp.lt.s32.totalorder %s2324_s28, %s2318_s19 }
 0x591   : > { %v1181_v8 = vmul.f32 %v2225_v6, %v1176_v7  ;;  %v2044_v9 = vpop.f32.mrb[13].mxu1 }
 0x592   : > { %p2327_p12 = por %p2326_p9, %p2325_p7 }
 0x593   : > { %1183 = vrot.lane.b32.xlu1 %v1181_v8, %s2424_s11 }
 0x594   : > { %v1350_v17 = vpop.f32.mrb[14].mxu1  ;;  %p2328_p2 = pnand %p2327_p12, %p2321_p3 }
 0x595   : > { %v1355_v18 = vmul.f32 %v2227_v16, %v1350_v17  ;;  %v2054_v19 = vpop.f32.mrb[15].mxu1 }
 0x597   : > { %1357 = vrot.lane.b32.xlu1 %v1355_v18, %s2425_s12 }
 0x598   : > { %v1524_v21 = vpop.f32.mrb[16].mxu1 }
 0x599   : > { %v1529_v22 = vmul.f32 %v2229_v20, %v1524_v21  ;;  %v2064_v23 = vpop.f32.mrb[17].mxu1 }
 0x59b   : > { %1531 = vrot.lane.b32.xlu0 %v1529_v22, %s2426_s7 }
 0x59c   : > { %v1698_v25 = vpop.f32.mrb[18].mxu1 }
 0x59d   : > { %v1703_v26 = vmul.f32 %v2231_v24, %v1698_v25  ;;  %v2074_v27 = vpop.f32.mrb[19].mxu1 }
 0x59f   : > { %1705 = vrot.lane.b32.xlu1 %v1703_v26, %s2427_s8 }
 0x5f9   : > { %v662_v28 = vpop.permute.xlu1 %661 }
 0x5fa   : > { %665 = vst.msk [vmem:[#allocation3] sm:$0xff] %vm664_vm5, %v662_v28 }
 0x5fd   : > { %v836_v0 = vpop.permute.xlu0 %835 }
 0x5fe   : > { %839 = vst.msk [vmem:[#allocation3] sm:$0xff] %vm838_vm6, %v836_v0 }
 0x601   : > { %v1010_v29 = vpop.permute.xlu1 %1009 }
 0x602   : > { %1013 = vst.msk [vmem:[#allocation3] sm:$0xff] %vm1012_vm7, %v1010_v29 }
 0x605   : > { %v1184_v30 = vpop.permute.xlu1 %1183 }
 0x606   : > { %1187 = vst.msk [vmem:[#allocation3] sm:$0xff] %vm1186_vm8, %v1184_v30 }
 0x609   : > { %v1358_v31 = vpop.permute.xlu1 %1357 }
 0x60a   : > { %1361 = vst.msk [vmem:[#allocation3] sm:$0xff] %vm1360_vm9, %v1358_v31 }
 0x60d   : > { %v1532_v32 = vpop.permute.xlu0 %1531 }
 0x60e   : > { %1535 = vst.msk [vmem:[#allocation3] sm:$0xff] %vm1534_vm10, %v1532_v32 }
 0x611   : > { %v1706_v33 = vpop.permute.xlu1 %1705 }
 0x612   : > { %1709 = vst.msk [vmem:[#allocation3] sm:$0xff] %vm1708_vm11, %v1706_v33 }
 0x619   : > { %v1710_v34 = vld [vmem:[#allocation3] sm:$0xff] }
 0x61a   : > { %2084 = vmatmul.mubr.msk.f32.vlgmr.msra.gmra.mrb[14].mxu0 %vm247_vm1, %v1710_v34 }
 0x6ed   : > { %v1791_v36 = vpop.f32.mrb[14].mxu0 }
 0x6ee   : > { %v1792_v37 = vadd.f32 %v1936_v35, %v1791_v36  ;;  %v2085_v38 = vpop.f32.mrb[15].mxu0 }
 0x6f0   : > { %1795 = vst.msk [vmem:[%s241_s30] sm:$0xff] %vm247_vm1, %v1792_v37 }
 0x6f1   : > { %2331 = shalt.err (!%p2328_p2)
}
 0x6f2   : > { %s2332_s29 = scalar_lea.hbm %s2796_s10, 128  ;;  %s2336_s7 = scalar_lea.hbm %s2845_s4, 256 }
 0x6f3   : > { %p2333_p13 = scmp.ne.s32.totalorder %s2796_s10, %s2332_s29  ;;  %p2337_p4 = scmp.lt.u32.totalorder %s2796_s10, %s2845_s4 }
 0x6f4   : > { %p2338_p5 = scmp.lt.u32.totalorder %s2336_s7, %s2332_s29  ;;  %p2340_p11 = scmp.lt.u32.totalorder %s2332_s29, %s2796_s10 }
 0x6f5   : > { %p2334_p6 = pnand %p2333_p13, %p2859_p0 }
 0x6f6   : > { %p2339_p8 = por %p2338_p5, %p2337_p4 }
 0x6f7   : > { %p2335_p10 = pneg %p2334_p6 }
 0x6f8   : > { %p2341_p1 = por %p2340_p11, %p2339_p8 }
 0x6fa   : > { %p2342_p3 = pnand %p2341_p1, %p2335_p10 }
 0x6fc   : > { %2345 = shalt.err (!%p2342_p3)
}
 0x6fd   : > { %2108 = dma.vmem_to_hbm [thread:$0]  (%p2859_p0), %s2798_s5, 128, %s2796_s10, %s1797_s24  }
 0x6fe PF: > { %s1822_s23 = sand.u32 1, %s2376_s15   ;;  %p2860_p7 = scmp.ne.s32.totalorder %s2850_s22, 0 }
 0x6ff   : > { %p2861_p9 = scmp.ge.s32.totalorder %s2388_s18, 2  ;;  %s1823_s27 = scalar_lea.sflag [#allocation6], %s1822_s23 }
 0x701   : > { %p2122_p12 = pnand %p2861_p9, %p2860_p7 }
 0x703   : > { %2371 = dma.done.wait (!%p2122_p12), %s1823_s27, 128  }
 0x704   : > { %2373 = vsyncadd (!%p2122_p12), %s1823_s27, 4294967168  ;;  %p18_p2 = scmp.ge.s32.totalorder %s2564_s9, 4   ;;  %s2862_s15 = smov %s2380_s16 }
 0x705   : > { %s2863_s16 = smov %s2384_s17  ;;  %s2864_s17 = smov %s2580_s14 }
 0x706   : > { %s2865_s18 = smov %s2564_s9  ;;  %20 = sbr.rel (!%p18_p2) target bundleno = 6 (0x6), region = 89 }
 0x70d   :  { %1828 = vsyncpa [#allocation5], 1 }
 0x70e   :  { %1830 = vsyncpa [#allocation5 + $0x1], 1 }
 0x70f   :  { %1831 = vsyncpa [#allocation8], 1 }
 0x710   :  { %1832 = vsyncpa [#allocation6], 1 }
 0x711   :  { %1834 = vsyncpa [#allocation6 + $0x1], 1 }

</bundles_post_ra>
